<compile_context>
chip_gen: v7x
topology: tpu7x:2x2x1
jax: 0.10.0
libtpu: 0.0.40
codegen_flags: <defaults>
</compile_context>

<pallas_src>
import numpy as np
import jax
import jax.numpy as jnp
from jax.experimental import pallas as pl
from jax.experimental.pallas import tpu as pltpu

RG = 25.0
OFFSET = 25.0
TEMPERATURE = 0.1
N_BRANCH = 4       # 3 predicted branches + processed ground-truth locations
FEAT = 10          # 5 waypoints x 2 coords, flattened
LANE = 128         # TPU lane width
MAX_TILE_B = 8192  # batch-tile on the lane axis (32 KiB/row DMA, ~2.5 MiB dbl-buffered)


def _round_up(x, m):
    return -(-x // m) * m


def _contrast_loss_kernel(p0_ref, p1_ref, p2_ref, p3_ref, lbl_ref, o_ref):
    # p*_ref:  [FEAT, TILE_B] f32 (lane-dense: batch on lanes)
    # lbl_ref: [1, TILE_B] int32
    # o_ref:   [1, TILE_B] f32  per-sample loss
    t = TEMPERATURE
    tile_b = o_ref.shape[-1]
    lbl = lbl_ref[...]                                     # [1, TILE_B]
    # Hoist the four branch loads out of the pair loop (each slab read once).
    p = [p0_ref[...], p1_ref[...], p2_ref[...], p3_ref[...]]

    sumexp_half = jnp.zeros((1, tile_b), jnp.float32)
    pos = jnp.zeros((1, tile_b), jnp.float32)
    # 6 unique pairs (i<j); distances are symmetric, so this covers all 12
    # off-diagonal entries with half the transcendental work.
    for i in range(N_BRANCH):
        for j in range(i + 1, N_BRANCH):
            diff = p[i] - p[j]
            d = jnp.sqrt(jnp.sum(diff * diff, axis=0, keepdims=True))  # [1, TILE_B]
            sumexp_half = sumexp_half + jnp.exp(-t * d)
            if j == N_BRANCH - 1:
                # "first positive" of the torch boolean gather == d(pred_{label-1}, gt)
                pos = jnp.where(lbl == (i + 1), d, pos)
    # -log softmax(-t * d_offdiag)[first positive]
    o_ref[...] = t * pos + jnp.log(2.0 * sumexp_half)


def contrast_location_loss(pred_locations_list, locations, labels,
                           rg=RG, offset=OFFSET):
    """JAX/Pallas equivalent of ContrastLocationLoss.forward (mode='l2')."""
    # Fused location normalization (single elementwise expression, no in-place update).
    loc = (locations.astype(jnp.float32)
           - jnp.asarray([0.0, offset], jnp.float32)) / jnp.asarray([rg, rg], jnp.float32)
    B = loc.shape[0]
    loc = loc.reshape(B, FEAT)

    # Batch-tile sizing: lane-aligned, capped at MAX_TILE_B, and shaped so the
    # "parallel" grid axis has >= 2 tiles when B > 128 (v7x dual-TC sharding).
    tile_b = min(MAX_TILE_B, max(LANE, _round_up(_round_up(B, 2) // 2, LANE)))
    b_pad = _round_up(B, tile_b)
    num_tiles = b_pad // tile_b
    pad_b = b_pad - B

    # One transpose+pad fusion per branch: [B, FEAT] -> [FEAT, b_pad].
    branches = [p.astype(jnp.float32) for p in pred_locations_list] + [loc]
    branches_t = [jnp.pad(jnp.transpose(p), ((0, 0), (0, pad_b))) for p in branches]
    lbl = jnp.pad(labels.astype(jnp.int32).reshape(1, B),
                  ((0, 0), (0, pad_b)))                    # label 0 matches no branch

    branch_spec = pl.BlockSpec((FEAT, tile_b), lambda i: (0, i))
    per_sample = pl.pallas_call(
        _contrast_loss_kernel,
        out_shape=jax.ShapeDtypeStruct((1, b_pad), jnp.float32),
        grid=(num_tiles,),
        in_specs=[branch_spec, branch_spec, branch_spec, branch_spec,
                  pl.BlockSpec((1, tile_b), lambda i: (0, i))],
        out_specs=pl.BlockSpec((1, tile_b), lambda i: (0, i)),
        compiler_params=pltpu.CompilerParams(dimension_semantics=("parallel",)),
    )(*branches_t, lbl)

    # Final tiny reduction over the valid batch in the wrapper
    # (padded lanes carry garbage log(12); do NOT sum over b_pad).
    return jnp.sum(per_sample[0, :B]) / B


def _ref_loss_np(pred_locations_list, locations, labels,
                 rg=RG, offset=OFFSET, temperature=TEMPERATURE):
    """NumPy reference that mirrors the torch forward pass literally."""
    locations = np.array(locations, np.float32).copy()
    locations[:, :, 1] -= offset
    locations = locations / np.array([rg, rg], np.float32)
    B = locations.shape[0]
    locations = locations.reshape(B, FEAT)
    preds = [np.array(p, np.float32) for p in pred_locations_list] + [locations]
    P = np.stack(preds, axis=1)                            # [B, 4, 10]
    labels = np.array(labels).reshape(B)
    branch_labels = np.concatenate(
        [np.tile(np.arange(3) + 1, (B, 1)), labels.reshape(B, 1)], axis=1)
    mask = (branch_labels[:, None, :] == branch_labels[:, :, None]).astype(np.float32)
    diff = P[:, :, None, :] - P[:, None, :, :]
    sim = np.sqrt((diff ** 2).sum(-1))                     # cdist, [B, 4, 4]
    offd = ~np.eye(4, dtype=bool)
    sim_off = sim[:, offd].reshape(B, 4, 3)
    msk_off = mask[:, offd].reshape(B, 4, 3)
    positives = sim_off[msk_off.astype(bool)].reshape(B, -1)
    negatives = sim_off[~msk_off.astype(bool)].reshape(B, -1)
    logits = np.concatenate([positives, negatives], axis=1) * temperature
    e = np.exp(-logits)
    p = e / e.sum(axis=1, keepdims=True)
    return float(-np.mean(np.log(p[:, 0])))


if __name__ == "__main__":
    key = jax.random.PRNGKey(0)
    B = 2
    k1, k2, k3, k4, k5 = jax.random.split(key, 5)
    # 3 branch predictions, each [B, 10] (already in normalized location space)
    pred0 = jax.random.normal(k1, (B, FEAT), jnp.float32)
    pred1 = jax.random.normal(k2, (B, FEAT), jnp.float32)
    pred2 = jax.random.normal(k3, (B, FEAT), jnp.float32)
    # Ground-truth locations [B, 5, 2] in raw (pixel-ish) coordinates
    locations = jax.random.uniform(k4, (B, 5, 2), jnp.float32, minval=0.0, maxval=50.0)
    # Command labels in {1, 2, 3}
    labels = jax.random.randint(k5, (B,), 1, 4, jnp.int32)

    loss = contrast_location_loss([pred0, pred1, pred2], locations, labels)
    loss = jax.block_until_ready(loss)

    ref = _ref_loss_np([pred0, pred1, pred2], locations, labels)
    np.testing.assert_allclose(np.asarray(loss), ref, rtol=1e-4, atol=1e-5)

    print("KERNEL_OK")
</pallas_src>

<mosaic_0001>
module attributes {stable_mosaic.version = 11 : i64} {
  func.func @_contrast_loss_kernel(%arg0: i32, %arg1: memref<10x128xf32, #tpu.memory_space<vmem>>, %arg2: memref<10x128xf32, #tpu.memory_space<vmem>>, %arg3: memref<10x128xf32, #tpu.memory_space<vmem>>, %arg4: memref<10x128xf32, #tpu.memory_space<vmem>>, %arg5: memref<1x128xi32, #tpu.memory_space<vmem>>, %arg6: memref<1x128xf32, #tpu.memory_space<vmem>>) attributes {dimension_semantics = [#tpu.dimension_semantics<parallel>], iteration_bounds = array<i64: 1>, scalar_prefetch = 0 : i64, scratch_operands = 0 : i64, tpu.core_type = #tpu.core_type<tc>, window_params = [{transform_indices = @transform_0, window_bounds = array<i64: 10, 128>}, {transform_indices = @transform_1, window_bounds = array<i64: 10, 128>}, {transform_indices = @transform_2, window_bounds = array<i64: 10, 128>}, {transform_indices = @transform_3, window_bounds = array<i64: 10, 128>}, {transform_indices = @transform_4, window_bounds = array<i64: 1, 128>}, {transform_indices = @transform_5, window_bounds = array<i64: 1, 128>}]} {
    %c0 = arith.constant 0 : index
    %c0_0 = arith.constant 0 : index
    %0 = vector.load %arg5[%c0, %c0_0] : memref<1x128xi32, #tpu.memory_space<vmem>>, vector<1x128xi32>
    %c0_1 = arith.constant 0 : index
    %c0_2 = arith.constant 0 : index
    %1 = vector.load %arg1[%c0_1, %c0_2] : memref<10x128xf32, #tpu.memory_space<vmem>>, vector<10x128xf32>
    %c0_3 = arith.constant 0 : index
    %c0_4 = arith.constant 0 : index
    %2 = vector.load %arg2[%c0_3, %c0_4] : memref<10x128xf32, #tpu.memory_space<vmem>>, vector<10x128xf32>
    %c0_5 = arith.constant 0 : index
    %c0_6 = arith.constant 0 : index
    %3 = vector.load %arg3[%c0_5, %c0_6] : memref<10x128xf32, #tpu.memory_space<vmem>>, vector<10x128xf32>
    %c0_7 = arith.constant 0 : index
    %c0_8 = arith.constant 0 : index
    %4 = vector.load %arg4[%c0_7, %c0_8] : memref<10x128xf32, #tpu.memory_space<vmem>>, vector<10x128xf32>
    %cst = arith.constant 0.000000e+00 : f32
    %5 = vector.broadcast %cst : f32 to vector<1x128xf32>
    %cst_9 = arith.constant 0.000000e+00 : f32
    %6 = vector.broadcast %cst_9 : f32 to vector<1x128xf32>
    %7 = arith.subf %1, %2 : vector<10x128xf32>
    %8 = arith.mulf %7, %7 : vector<10x128xf32>
    %cst_10 = arith.constant dense<0.000000e+00> : vector<128xf32>
    %9 = vector.multi_reduction <add>, %8, %cst_10 [0] : vector<10x128xf32> to vector<128xf32>
    %10 = vector.shape_cast %9 : vector<128xf32> to vector<1x128xf32>
    %11 = math.sqrt %10 : vector<1x128xf32>
    %cst_11 = arith.constant -1.000000e-01 : f32
    %12 = vector.broadcast %cst_11 : f32 to vector<1x128xf32>
    %13 = arith.mulf %12, %11 : vector<1x128xf32>
    %14 = math.exp %13 : vector<1x128xf32>
    %15 = arith.addf %5, %14 : vector<1x128xf32>
    %16 = arith.subf %1, %3 : vector<10x128xf32>
    %17 = arith.mulf %16, %16 : vector<10x128xf32>
    %cst_12 = arith.constant dense<0.000000e+00> : vector<128xf32>
    %18 = vector.multi_reduction <add>, %17, %cst_12 [0] : vector<10x128xf32> to vector<128xf32>
    %19 = vector.shape_cast %18 : vector<128xf32> to vector<1x128xf32>
    %20 = math.sqrt %19 : vector<1x128xf32>
    %cst_13 = arith.constant -1.000000e-01 : f32
    %21 = vector.broadcast %cst_13 : f32 to vector<1x128xf32>
    %22 = arith.mulf %21, %20 : vector<1x128xf32>
    %23 = math.exp %22 : vector<1x128xf32>
    %24 = arith.addf %15, %23 : vector<1x128xf32>
    %25 = arith.subf %1, %4 : vector<10x128xf32>
    %26 = arith.mulf %25, %25 : vector<10x128xf32>
    %cst_14 = arith.constant dense<0.000000e+00> : vector<128xf32>
    %27 = vector.multi_reduction <add>, %26, %cst_14 [0] : vector<10x128xf32> to vector<128xf32>
    %28 = vector.shape_cast %27 : vector<128xf32> to vector<1x128xf32>
    %29 = math.sqrt %28 : vector<1x128xf32>
    %cst_15 = arith.constant -1.000000e-01 : f32
    %30 = vector.broadcast %cst_15 : f32 to vector<1x128xf32>
    %31 = arith.mulf %30, %29 : vector<1x128xf32>
    %32 = math.exp %31 : vector<1x128xf32>
    %33 = arith.addf %24, %32 : vector<1x128xf32>
    %c1_i32 = arith.constant 1 : i32
    %34 = vector.broadcast %c1_i32 : i32 to vector<1x128xi32>
    %35 = arith.cmpi eq, %0, %34 : vector<1x128xi32>
    %36 = arith.select %35, %29, %6 : vector<1x128xi1>, vector<1x128xf32>
    %37 = arith.subf %2, %3 : vector<10x128xf32>
    %38 = arith.mulf %37, %37 : vector<10x128xf32>
    %cst_16 = arith.constant dense<0.000000e+00> : vector<128xf32>
    %39 = vector.multi_reduction <add>, %38, %cst_16 [0] : vector<10x128xf32> to vector<128xf32>
    %40 = vector.shape_cast %39 : vector<128xf32> to vector<1x128xf32>
    %41 = math.sqrt %40 : vector<1x128xf32>
    %cst_17 = arith.constant -1.000000e-01 : f32
    %42 = vector.broadcast %cst_17 : f32 to vector<1x128xf32>
    %43 = arith.mulf %42, %41 : vector<1x128xf32>
    %44 = math.exp %43 : vector<1x128xf32>
    %45 = arith.addf %33, %44 : vector<1x128xf32>
    %46 = arith.subf %2, %4 : vector<10x128xf32>
    %47 = arith.mulf %46, %46 : vector<10x128xf32>
    %cst_18 = arith.constant dense<0.000000e+00> : vector<128xf32>
    %48 = vector.multi_reduction <add>, %47, %cst_18 [0] : vector<10x128xf32> to vector<128xf32>
    %49 = vector.shape_cast %48 : vector<128xf32> to vector<1x128xf32>
    %50 = math.sqrt %49 : vector<1x128xf32>
    %cst_19 = arith.constant -1.000000e-01 : f32
    %51 = vector.broadcast %cst_19 : f32 to vector<1x128xf32>
    %52 = arith.mulf %51, %50 : vector<1x128xf32>
    %53 = math.exp %52 : vector<1x128xf32>
    %54 = arith.addf %45, %53 : vector<1x128xf32>
    %c2_i32 = arith.constant 2 : i32
    %55 = vector.broadcast %c2_i32 : i32 to vector<1x128xi32>
    %56 = arith.cmpi eq, %0, %55 : vector<1x128xi32>
    %57 = arith.select %56, %50, %36 : vector<1x128xi1>, vector<1x128xf32>
    %58 = arith.subf %3, %4 : vector<10x128xf32>
    %59 = arith.mulf %58, %58 : vector<10x128xf32>
    %cst_20 = arith.constant dense<0.000000e+00> : vector<128xf32>
    %60 = vector.multi_reduction <add>, %59, %cst_20 [0] : vector<10x128xf32> to vector<128xf32>
    %61 = vector.shape_cast %60 : vector<128xf32> to vector<1x128xf32>
    %62 = math.sqrt %61 : vector<1x128xf32>
    %cst_21 = arith.constant -1.000000e-01 : f32
    %63 = vector.broadcast %cst_21 : f32 to vector<1x128xf32>
    %64 = arith.mulf %63, %62 : vector<1x128xf32>
    %65 = math.exp %64 : vector<1x128xf32>
    %66 = arith.addf %54, %65 : vector<1x128xf32>
    %c3_i32 = arith.constant 3 : i32
    %67 = vector.broadcast %c3_i32 : i32 to vector<1x128xi32>
    %68 = arith.cmpi eq, %0, %67 : vector<1x128xi32>
    %69 = arith.select %68, %62, %57 : vector<1x128xi1>, vector<1x128xf32>
    %cst_22 = arith.constant 1.000000e-01 : f32
    %70 = vector.broadcast %cst_22 : f32 to vector<1x128xf32>
    %71 = arith.mulf %70, %69 : vector<1x128xf32>
    %cst_23 = arith.constant 2.000000e+00 : f32
    %72 = vector.broadcast %cst_23 : f32 to vector<1x128xf32>
    %73 = arith.mulf %72, %66 : vector<1x128xf32>
    %74 = math.log %73 : vector<1x128xf32>
    %75 = arith.addf %71, %74 : vector<1x128xf32>
    %c0_24 = arith.constant 0 : index
    %c0_25 = arith.constant 0 : index
    %76 = vector.load %arg6[%c0_24, %c0_25] : memref<1x128xf32, #tpu.memory_space<vmem>>, vector<1x128xf32>
    tpu.vector_store %arg6[%c0_24, %c0_25], %75 {strides = array<i32>} : memref<1x128xf32, #tpu.memory_space<vmem>>, vector<1x128xf32>,
    return
  }
  func.func @transform_0(%arg0: i32) -> (i32, i32) {
    %c0_i32 = arith.constant 0 : i32
    %c0_i32_0 = arith.constant 0 : i32
    return %c0_i32, %arg0 : i32, i32
  }
  func.func @transform_1(%arg0: i32) -> (i32, i32) {
    %c0_i32 = arith.constant 0 : i32
    %c0_i32_0 = arith.constant 0 : i32
    return %c0_i32, %arg0 : i32, i32
  }
  func.func @transform_2(%arg0: i32) -> (i32, i32) {
    %c0_i32 = arith.constant 0 : i32
    %c0_i32_0 = arith.constant 0 : i32
    return %c0_i32, %arg0 : i32, i32
  }
  func.func @transform_3(%arg0: i32) -> (i32, i32) {
    %c0_i32 = arith.constant 0 : i32
    %c0_i32_0 = arith.constant 0 : i32
    return %c0_i32, %arg0 : i32, i32
  }
  func.func @transform_4(%arg0: i32) -> (i32, i32) {
    %c0_i32 = arith.constant 0 : i32
    %c0_i32_0 = arith.constant 0 : i32
    return %c0_i32, %arg0 : i32, i32
  }
  func.func @transform_5(%arg0: i32) -> (i32, i32) {
    %c0_i32 = arith.constant 0 : i32
    %c0_i32_0 = arith.constant 0 : i32
    return %c0_i32, %arg0 : i32, i32
  }
}

</mosaic_0001>

<bundles_post_ra>
// kernel: tpu_custom_call.1
= control target key start
LH: loop header
LB: loop body
LE: loop exit
PB: predicated region body
PF: predicated region fallthrough
CT: control target
= control target key end

     0   :  { %10 = vsyncpa [#allocation3], 0  ;;  %s542_s0 = inlined_call_operand.hbm [shape: f32[10,128], index: 0, kind: input, shape index: {}]   ;;  %s543_s1 = inlined_call_operand.hbm [shape: f32[10,128], index: 1, kind: input, shape index: {}]   ;;  %s544_s2 = inlined_call_operand.hbm [shape: f32[10,128], index: 2, kind: input, shape index: {}]   ;;  %s545_s3 = inlined_call_operand.hbm [shape: f32[10,128], index: 3, kind: input, shape index: {}]   ;;  %s546_s4 = inlined_call_operand.vmem [shape: s32[1,128], index: 4, kind: input, shape index: {}]   ;;  %s547_s5 = inlined_call_operand.hbm [shape: f32[1,128], index: 5, kind: output, shape index: {}]  }
   0x1   :  { %11 = vsyncpa [#allocation6], 0 }
   0x2   :  { %12 = vsyncpa [#allocation9], 0 }
   0x3   :  { %13 = vsyncpa [#allocation4], 0  ;;  %s404_s18 = smov [#allocation5]   ;;  %s405_s20 = smov [#allocation2]  }
   0x4   :  { %s31_s19 = sshll.u32 %s404_s18, 4  ;;  %s19_s21 = sshll.u32 %s405_s20, 4  ;;  %s32_s19 = int_to_ptr.vmem [resolvable:$true] %s31_s19  ;;  %s441_s21 = int_to_ptr.vmem [resolvable:$true] %s19_s21 }
   0x5   :  { %s286_s24 = scalar_lea.hbm %s543_s1, 256 }
   0x6   :  { %p287_p0 = scmp.ne.s32.totalorder %s543_s1, %s286_s24  ;;  %p290_p1 = scmp.lt.u32.totalorder %s286_s24, %s543_s1 }
   0x8   :  { %p292_p2 = pnand %p290_p1, %p287_p0 }
   0xa   :  { %295 = shalt.err (!%p292_p2)
}
   0xb   :  { %s296_s29 = scalar_lea.vmem %s32_s19, 256  ;;  %p301_p4 = scmp.lt.s32.totalorder %s32_s19, %s32_s19 }
   0xc   :  { %p297_p3 = scmp.ne.s32.totalorder %s32_s19, %s296_s29  ;;  %p302_p5 = scmp.lt.s32.totalorder %s296_s29, %s296_s29 }
   0xe   :  { %p303_p6 = por %p302_p5, %p301_p4 }
  0x10   :  { %p304_p7 = pnand %p303_p6, %p297_p3 }
  0x12   :  { %307 = shalt.err (!%p304_p7)
}
  0x13   :  { %s406_s30 = smov 128   ;;  %s407_s6 = smov 8  }
  0x14   :  { %37 = dma.hbm_to_vmem [thread:$0]  %s543_s1, 256, %s32_s19, [#allocation6], %s406_s30, %s406_s30, %s407_s6  }
  0x15   :  { %s308_s11 = scalar_lea.hbm %s542_s0, 256 }
  0x16   :  { %p309_p8 = scmp.ne.s32.totalorder %s542_s0, %s308_s11  ;;  %p312_p9 = scmp.lt.u32.totalorder %s308_s11, %s542_s0 }
  0x18   :  { %p314_p10 = pnand %p312_p9, %p309_p8 }
  0x1a   :  { %317 = shalt.err (!%p314_p10)
}
  0x1b   :  { %s318_s16 = scalar_lea.vmem %s441_s21, 256  ;;  %p323_p12 = scmp.lt.s32.totalorder %s441_s21, %s441_s21 }
  0x1c   :  { %p319_p11 = scmp.ne.s32.totalorder %s441_s21, %s318_s16  ;;  %p324_p13 = scmp.lt.s32.totalorder %s318_s16, %s318_s16 }
  0x1e   :  { %p325_p0 = por %p324_p13, %p323_p12 }
  0x20   :  { %p326_p1 = pnand %p325_p0, %p319_p11 }
  0x22   :  { %329 = shalt.err (!%p326_p1)
}
  0x23   :  { %25 = dma.hbm_to_vmem [thread:$0]  %s542_s0, 256, %s441_s21, [#allocation3], %s406_s30, %s406_s30, %s407_s6  }
  0x24   :  { %s408_s18 = smov [#allocation7]   ;;  %s409_s20 = smov [#allocation8]  }
  0x25   :  { %s43_s19 = sshll.u32 %s408_s18, 4  ;;  %s55_s22 = sshll.u32 %s409_s20, 4  ;;  %s44_s19 = int_to_ptr.vmem [resolvable:$true] %s43_s19  ;;  %s478_s22 = int_to_ptr.vmem [resolvable:$true] %s55_s22 }
  0x26   :  { %s330_s25 = scalar_lea.hbm %s544_s2, 256 }
  0x27   :  { %p331_p2 = scmp.ne.s32.totalorder %s544_s2, %s330_s25  ;;  %p334_p3 = scmp.lt.u32.totalorder %s330_s25, %s544_s2 }
  0x29   :  { %p336_p4 = pnand %p334_p3, %p331_p2 }
  0x2b   :  { %339 = shalt.err (!%p336_p4)
}
  0x2c   :  { %s340_s0 = scalar_lea.vmem %s44_s19, 256  ;;  %p345_p6 = scmp.lt.s32.totalorder %s44_s19, %s44_s19 }
  0x2d   :  { %p341_p5 = scmp.ne.s32.totalorder %s44_s19, %s340_s0  ;;  %p346_p7 = scmp.lt.s32.totalorder %s340_s0, %s340_s0 }
  0x2f   :  { %p347_p8 = por %p346_p7, %p345_p6 }
  0x31   :  { %p348_p9 = pnand %p347_p8, %p341_p5 }
  0x33   :  { %351 = shalt.err (!%p348_p9)
}
  0x34   :  { %49 = dma.hbm_to_vmem [thread:$0]  %s544_s2, 256, %s44_s19, [#allocation6], %s406_s30, %s406_s30, %s407_s6  }
  0x35   :  { %s352_s10 = scalar_lea.hbm %s545_s3, 256 }
  0x36   :  { %p353_p10 = scmp.ne.s32.totalorder %s545_s3, %s352_s10  ;;  %p356_p11 = scmp.lt.u32.totalorder %s352_s10, %s545_s3 }
  0x38   :  { %p358_p12 = pnand %p356_p11, %p353_p10 }
  0x3a   :  { %361 = shalt.err (!%p358_p12)
}
  0x3b   :  { %s362_s15 = scalar_lea.vmem %s478_s22, 256  ;;  %p367_p0 = scmp.lt.s32.totalorder %s478_s22, %s478_s22 }
  0x3c   :  { %p363_p13 = scmp.ne.s32.totalorder %s478_s22, %s362_s15  ;;  %p368_p1 = scmp.lt.s32.totalorder %s362_s15, %s362_s15 }
  0x3e   :  { %p369_p2 = por %p368_p1, %p367_p0 }
  0x40   :  { %p370_p3 = pnand %p369_p2, %p363_p13 }
  0x42   :  { %373 = shalt.err (!%p370_p3)
}
  0x43   :  { %61 = dma.hbm_to_vmem [thread:$0]  %s545_s3, 256, %s478_s22, [#allocation9], %s406_s30, %s406_s30, %s407_s6  }
  0x44   :  { %396 = dma.done.wait [#allocation3], 256  }
  0x45   :  { %397 = vsyncadd [#allocation3], 4294967040 }
  0x46   :  { %398 = dma.done.wait [#allocation6], 512  }
  0x47   :  { %399 = vsyncadd [#allocation6], 4294966784 }
  0x48   :  { %400 = dma.done.wait [#allocation9], 256  }
  0x49   :  { %401 = vsyncadd [#allocation9], 4294967040  ;;  %v77_v0 = vld [vmem:[#allocation2] sm:$0xff]  ;;  %v78_v1 = vld [vmem:[#allocation2 + $0x8] sm:$0x3]  ;;  %vm89_vm0 = vcmask 1041408  }
  0x4a   :  { %v79_v2 = vld [vmem:[#allocation5] sm:$0xff]  ;;  %v80_v3 = vld [vmem:[#allocation5 + $0x8] sm:$0x3]  ;;  %v81_v4 = vld [vmem:[#allocation7] sm:$0xff]  ;;  %s410_s6 = smov [#allocation10]  }
  0x4b   :  { %v82_v5 = vld [vmem:[#allocation7 + $0x8] sm:$0x3]  ;;  %v83_v6 = vld [vmem:[#allocation8] sm:$0xff]  ;;  %v84_v7 = vld [vmem:[#allocation8 + $0x8] sm:$0x3]  ;;  %v85_v8 = vsub.f32 %v77_v0, %v79_v2  ;;  %v86_v9 = vsub.f32 %v78_v1, %v80_v3  ;;  %v109_v10 = vsub.f32 %v77_v0, %v81_v4  ;;  %v157_v11 = vsub.f32 %v79_v2, %v81_v4  ;;  %s242_s1 = sshll.u32 %s410_s6, 4  ;;  %s243_s1 = int_to_ptr.vmem [resolvable:$true] %s242_s1 }
  0x4c   :  { %v110_v12 = vsub.f32 %v78_v1, %v82_v5  ;;  %v132_v13 = vsub.f32 %v77_v0, %v83_v6  ;;  %v133_v14 = vsub.f32 %v78_v1, %v84_v7  ;;  %v158_v15 = vsub.f32 %v80_v3, %v82_v5  ;;  %s374_s17 = scalar_lea.vmem %s243_s1, 16  ;;  %p379_p5 = scmp.lt.s32.totalorder %s243_s1, %s243_s1 }
  0x4d   :  { %v87_v16 = vmul.f32 %v85_v8, %v85_v8  ;;  %v88_v17 = vmul.f32 %v86_v9, %v86_v9  ;;  %v111_v18 = vmul.f32 %v109_v10, %v109_v10  ;;  %v159_v19 = vmul.f32 %v157_v11, %v157_v11  ;;  %p375_p4 = scmp.ne.s32.totalorder %s243_s1, %s374_s17 }
  0x4e   :  { %v112_v20 = vmul.f32 %v110_v12, %v110_v12  ;;  %v134_v21 = vmul.f32 %v132_v13, %v132_v13  ;;  %v135_v22 = vmul.f32 %v133_v14, %v133_v14  ;;  %v160_v23 = vmul.f32 %v158_v15, %v158_v15 }
  0x4f   :  { %v90_v24 = vsel %vm89_vm0, %v88_v17, 0.0  ;;  %v180_v25 = vsub.f32 %v79_v2, %v83_v6  ;;  %v181_v26 = vsub.f32 %v80_v3, %v84_v7  ;;  %v205_v27 = vsub.f32 %v81_v4, %v83_v6 }
  0x50   :  { %v91_v28 = vadd.f32 %v90_v24, %v87_v16  ;;  %v113_v29 = vsel %vm89_vm0, %v112_v20, 0.0  ;;  %v136_v30 = vsel %vm89_vm0, %v135_v22, 0.0  ;;  %v161_v31 = vsel %vm89_vm0, %v160_v23, 0.0 }
  0x51   :  { %v114_v32 = vadd.f32 %v113_v29, %v111_v18  ;;  %v137_v33 = vadd.f32 %v136_v30, %v134_v21  ;;  %v162_v34 = vadd.f32 %v161_v31, %v159_v19  ;;  %v182_v35 = vmul.f32 %v180_v25, %v180_v25 }
  0x52   :  { %v92_v36 = vrot.slane %v91_v28, 4  ;;  %v183_v37 = vmul.f32 %v181_v26, %v181_v26  ;;  %v206_v38 = vsub.f32 %v82_v5, %v84_v7  ;;  %v207_v44 = vmul.f32 %v205_v27, %v205_v27 }
  0x53   :  { %v115_v39 = vrot.slane %v114_v32, 4  ;;  %v138_v40 = vrot.slane %v137_v33, 4  ;;  %v163_v41 = vrot.slane %v162_v34, 4 }
  0x54   :  { %v93_v42 = vadd.f32 %v92_v36, %v91_v28  ;;  %v184_v43 = vsel %vm89_vm0, %v183_v37, 0.0  ;;  %v208_v45 = vmul.f32 %v206_v38, %v206_v38 }
  0x55   :  { %v116_v46 = vadd.f32 %v115_v39, %v114_v32  ;;  %v139_v47 = vadd.f32 %v138_v40, %v137_v33  ;;  %v164_v48 = vadd.f32 %v163_v41, %v162_v34  ;;  %v185_v49 = vadd.f32 %v184_v43, %v182_v35 }
  0x56   :  { %v94_v50 = vrot.slane %v93_v42, 2  ;;  %v209_v51 = vsel %vm89_vm0, %v208_v45, 0.0 }
  0x57   :  { %v117_v52 = vrot.slane %v116_v46, 2  ;;  %v140_v53 = vrot.slane %v139_v47, 2  ;;  %v165_v54 = vrot.slane %v164_v48, 2  ;;  %v186_v55 = vrot.slane %v185_v49, 4 }
  0x58   :  { %v95_v56 = vadd.f32 %v94_v50, %v93_v42  ;;  %v210_v57 = vadd.f32 %v209_v51, %v207_v44 }
  0x59   :  { %v118_v58 = vadd.f32 %v117_v52, %v116_v46  ;;  %v141_v59 = vadd.f32 %v140_v53, %v139_v47  ;;  %v166_v60 = vadd.f32 %v165_v54, %v164_v48  ;;  %v187_v61 = vadd.f32 %v186_v55, %v185_v49 }
  0x5a   :  { %v96_v62 = vrot.slane %v95_v56, 1  ;;  %v211_v63 = vrot.slane %v210_v57, 4 }
  0x5b   :  { %v119_v0 = vrot.slane %v118_v58, 1  ;;  %v142_v1 = vrot.slane %v141_v59, 1  ;;  %v167_v2 = vrot.slane %v166_v60, 1  ;;  %v188_v3 = vrot.slane %v187_v61, 2 }
  0x5c   :  { %v97_v4 = vadd.f32 %v96_v62, %v95_v56  ;;  %v212_v9 = vadd.f32 %v211_v63, %v210_v57 }
  0x5d   :  { %v120_v5 = vadd.f32 %v119_v0, %v118_v58  ;;  %v143_v6 = vadd.f32 %v142_v1, %v141_v59  ;;  %v168_v7 = vadd.f32 %v167_v2, %v166_v60  ;;  %v189_v8 = vadd.f32 %v188_v3, %v187_v61  ;;  %v76_v3 = vld [vmem:[%s546_s4] sm:$0x1]  ;;  %s378_s4 = scalar_lea.vmem %s243_s1, 32 }
  0x5e   :  { %260 = vrsqrt.f32 %v97_v4  ;;  %v213_v11 = vrot.slane %v212_v9, 2  ;;  %vm100_vm1 = vcmp.eq.f32.partialorder %v97_v4, inf  ;;  %vm102_vm2 = vcmp.eq.f32.partialorder %v97_v4, 0.0  ;;  %p380_p6 = scmp.lt.s32.totalorder %s378_s4, %s374_s17 }
  0x5f   :  { %262 = vrsqrt.f32 %v120_v5  ;;  %v190_v10 = vrot.slane %v189_v8, 1  ;;  %v103_v16 = vand.u32 2147483648, %v97_v4  ;;  %vm123_vm3 = vcmp.eq.f32.partialorder %v120_v5, inf }
  0x60   :  { %264 = vrsqrt.f32 %v143_v6  ;;  %v214_v13 = vadd.f32 %v213_v11, %v212_v9  ;;  %vm125_vm4 = vcmp.eq.f32.partialorder %v120_v5, 0.0  ;;  %v126_v19 = vand.u32 2147483648, %v120_v5  ;;  %p381_p7 = por %p380_p6, %p379_p5 }
  0x61   :  { %266 = vrsqrt.f32 %v168_v7  ;;  %v191_v12 = vadd.f32 %v190_v10, %v189_v8  ;;  %vm146_vm5 = vcmp.eq.f32.partialorder %v143_v6, inf  ;;  %vm148_vm6 = vcmp.eq.f32.partialorder %v143_v6, 0.0 }
  0x62   :  { %v215_v14 = vrot.slane %v214_v13, 1  ;;  %v149_v23 = vand.u32 2147483648, %v143_v6  ;;  %vm171_vm7 = vcmp.eq.f32.partialorder %v168_v7, inf  ;;  %v174_v27 = vand.u32 2147483648, %v168_v7  ;;  %p382_p8 = pnand %p381_p7, %p375_p4 }
  0x63   :  { %268 = vrsqrt.f32 %v191_v12  ;;  %vm173_vm8 = vcmp.eq.f32.partialorder %v168_v7, 0.0  ;;  %vm194_vm9 = vcmp.eq.f32.partialorder %v191_v12, inf  ;;  %v197_v43 = vand.u32 2147483648, %v191_v12 }
  0x64   :  { %v216_v20 = vadd.f32 %v215_v14, %v214_v13  ;;  %vm196_vm10 = vcmp.eq.f32.partialorder %v191_v12, 0.0  ;;  %vm155_vm13 = vcmp.eq.s32.totalorder %v76_v3, 1  ;;  %vm203_vm14 = vcmp.eq.s32.totalorder %v76_v3, 2 }
  0x65   :  { %vm228_vm15 = vcmp.eq.s32.totalorder %v76_v3, 3 }
  0x66   :  { %270 = vrsqrt.f32 %v216_v20  ;;  %vm219_vm11 = vcmp.eq.f32.partialorder %v216_v20, inf  ;;  %v222_v51 = vand.u32 2147483648, %v216_v20  ;;  %vm221_vm12 = vcmp.eq.f32.partialorder %v216_v20, 0.0 }
  0x68   :  { %v261_v15 = vpop.eup %260 }
  0x69   :  { %v263_v17 = vpop.eup %262  ;;  %v99_v18 = vmul.f32 %v261_v15, %v97_v4 }
  0x6a   :  { %v265_v21 = vpop.eup %264  ;;  %v122_v22 = vmul.f32 %v263_v17, %v120_v5 }
  0x6b   :  { %v267_v24 = vpop.eup %266  ;;  %v101_v25 = vsel %vm100_vm1, %v97_v4, %v99_v18  ;;  %v145_v26 = vmul.f32 %v265_v21, %v143_v6 }
  0x6c   :  { %v104_v28 = vsel %vm102_vm2, %v103_v16, %v101_v25  ;;  %v124_v29 = vsel %vm123_vm3, %v120_v5, %v122_v22  ;;  %v170_v30 = vmul.f32 %v267_v24, %v168_v7 }
  0x6d   :  { %v105_v31 = vmul.f32 -0.1, %v104_v28  ;;  %v127_v32 = vsel %vm125_vm4, %v126_v19, %v124_v29  ;;  %v147_v33 = vsel %vm146_vm5, %v143_v6, %v145_v26  ;;  %v269_v40 = vpop.eup %268 }
  0x6e   :  { %v128_v34 = vmul.f32 -0.1, %v127_v32  ;;  %v150_v35 = vsel %vm148_vm6, %v149_v23, %v147_v33  ;;  %v172_v36 = vsel %vm171_vm7, %v168_v7, %v170_v30  ;;  %v193_v45 = vmul.f32 %v269_v40, %v191_v12 }
  0x6f   :  { %v106_v37 = vmul.f32 1.442695, %v105_v31  ;;  %v151_v38 = vmul.f32 -0.1, %v150_v35  ;;  %v175_v39 = vsel %vm173_vm8, %v174_v27, %v172_v36  ;;  %v156_v7 = vsel %vm155_vm13, %v150_v35, 0.0 }
  0x70   :  { %v129_v41 = vmul.f32 1.442695, %v128_v34  ;;  %v176_v42 = vmul.f32 -0.1, %v175_v39  ;;  %v195_v47 = vsel %vm194_vm9, %v191_v12, %v193_v45  ;;  %v271_v49 = vpop.eup %270 }
  0x71   :  { %272 = vpow2.f32 %v106_v37  ;;  %v152_v44 = vmul.f32 1.442695, %v151_v38  ;;  %v198_v48 = vsel %vm196_vm10, %v197_v43, %v195_v47  ;;  %v218_v52 = vmul.f32 %v271_v49, %v216_v20 }
  0x72   :  { %274 = vpow2.f32 %v129_v41  ;;  %v177_v46 = vmul.f32 1.442695, %v176_v42  ;;  %v199_v50 = vmul.f32 -0.1, %v198_v48  ;;  %v204_v8 = vsel %vm203_vm14, %v198_v48, %v156_v7 }
  0x73   :  { %276 = vpow2.f32 %v152_v44  ;;  %v220_v54 = vsel %vm219_vm11, %v216_v20, %v218_v52 }
  0x74   :  { %278 = vpow2.f32 %v177_v46  ;;  %v200_v53 = vmul.f32 1.442695, %v199_v50  ;;  %v223_v55 = vsel %vm221_vm12, %v222_v51, %v220_v54 }
  0x75   :  { %v224_v56 = vmul.f32 -0.1, %v223_v55  ;;  %v229_v9 = vsel %vm228_vm15, %v223_v55, %v204_v8 }
  0x76   :  { %280 = vpow2.f32 %v200_v53  ;;  %v230_v10 = vmul.f32 0.1, %v229_v9 }
  0x77   :  { %v225_v59 = vmul.f32 1.442695, %v224_v56 }
  0x79   :  { %282 = vpow2.f32 %v225_v59 }
  0x7b   :  { %v273_v57 = vpop.eup %272 }
  0x7c   :  { %v275_v58 = vpop.eup %274 }
  0x7d   :  { %v277_v60 = vpop.eup %276  ;;  %v131_v61 = vadd.f32 %v275_v58, %v273_v57 }
  0x7e   :  { %v279_v62 = vpop.eup %278 }
  0x7f   :  { %v154_v63 = vadd.f32 %v277_v60, %v131_v61 }
  0x80   :  { %v281_v1 = vpop.eup %280 }
  0x81   :  { %v179_v0 = vadd.f32 %v279_v62, %v154_v63 }
  0x83   :  { %v202_v2 = vadd.f32 %v281_v1, %v179_v0  ;;  %v283_v4 = vpop.eup %282 }
  0x85   :  { %v227_v5 = vadd.f32 %v283_v4, %v202_v2 }
  0x87   :  { %v231_v6 = vmul.f32 2.0, %v227_v5 }
  0x89   :  { %284 = vlog2.f32 %v231_v6 }
  0x93   :  { %v285_v11 = vpop.eup %284 }
  0x94   :  { %v233_v12 = vmul.f32 0.6931472, %v285_v11 }
  0x96   :  { %v234_v13 = vadd.f32 %v233_v12, %v230_v10 }
  0x98   :  { %235 = vst [vmem:[#allocation10] sm:$0x1] %v234_v13 }
  0x99   :  { %385 = shalt.err (!%p382_p8)
}
  0x9a   :  { %s386_s20 = scalar_lea.hbm %s547_s5, 16 }
  0x9b   :  { %p387_p9 = scmp.ne.s32.totalorder %s547_s5, %s386_s20  ;;  %p390_p10 = scmp.lt.u32.totalorder %s386_s20, %s547_s5 }
  0x9d   :  { %p392_p11 = pnand %p390_p10, %p387_p9 }
  0x9f   :  { %395 = shalt.err (!%p392_p11)
}
  0xa0   :  { %245 = dma.vmem_to_hbm [thread:$0]  %s243_s1, 16, %s547_s5, [#allocation4]  }
  0xa1   :  { %402 = dma.done.wait [#allocation4], 16  }
  0xa2   :  { %403 = vsyncadd [#allocation4], 4294967280 }
  0xa3   :  { %249 = vsyncpa [#allocation3], 1 }
  0xa4   :  { %250 = vsyncpa [#allocation6], 1 }
  0xa5   :  { %251 = vsyncpa [#allocation9], 1 }
  0xa6   :  { %252 = vsyncpa [#allocation4], 1 }

</bundles_post_ra>
